<compile_context>
chip_gen: v6e
topology: v6e:2x2x1
jax: 0.10.0
libtpu: 0.0.40
codegen_flags: <defaults>
</compile_context>

<pallas_src>
import jax
import jax.numpy as jnp
from jax.experimental import pallas as pl
from jax.experimental.pallas import tpu as pltpu


def _transpose_kernel(x_ref, o_ref):
    # Batch dim is pl.Squeezed(): x_ref is (c_tile, t_tile), o_ref (t_tile, c_tile).
    # Minor-dim swap lowers to the XLU; MXU/VPU stay idle, HBM is the bottleneck.
    o_ref[...] = x_ref[...].T


def _hw_vmem_budget():
    """~75% of per-core physical VMEM (v5e/v6e: 128 MiB, v7x: 64 MiB)."""
    try:
        phys = int(pltpu.get_tpu_info().vmem_capacity_bytes)
    except Exception:  # pragma: no cover - conservative fallback (assume v7x)
        phys = 64 << 20
    return (phys * 3) // 4


def _choose_tiles(C, T, dsize, budget):
    """Pick (c_tile, t_tile), or None if nothing fits the VMEM budget."""

    def fits(ct, tt):
        # in tile + out tile, each double-buffered by the pipeline.
        return 4 * ct * tt * dsize <= budget

    # Lane-dense T tiles. 2048 targets ~8 MiB in+out per step for f32 C=512
    # (keeps grid-step overhead <10% at v7x HBM speeds); smaller entries serve
    # v5e/v6e and short sequences.
    t_candidates = [t for t in (2048, 1024, 512, 256, 128) if T % t == 0]

    # (a) Full-C tile: output block (t_tile, C) is one contiguous HBM region
    #     -> single unstrided writeback DMA, and the C grid axis vanishes.
    for tt in t_candidates:
        if fits(C, tt):
            return C, tt
    # (b) Lane-dense (x128) channel tiles if full C is too big for VMEM.
    for ct in (512, 256, 128):
        if C % ct:
            continue
        for tt in t_candidates:
            if fits(ct, tt):
                return ct, tt
    # (c) Full-extent block (small or non-128-divisible tensors) only if it
    #     actually fits this generation's budget (guards v7x's 64 MiB VMEM).
    if fits(C, T):
        return C, T
    return None


def _batched_transpose_021(x):
    """(B, C, T) -> (B, T, C) via a lane-dense, tiled Pallas transpose."""
    B, C, T = x.shape
    dsize = x.dtype.itemsize

    # Lane-starved tensors (e.g. the early-conv C=4 features): in-kernel stores
    # would be heavily masked; XLA's transpose is at least as good there.
    if C < 128 or T < 128:
        return jnp.transpose(x, (0, 2, 1))

    budget = _hw_vmem_budget()
    tiles = _choose_tiles(C, T, dsize, budget)
    if tiles is None:
        # No tiling fits this generation's VMEM (e.g. huge non-128-divisible T
        # on v7x).  TODO(synk): masked remainder blocks instead of falling back.
        return jnp.transpose(x, (0, 2, 1))
    c_tile, t_tile = tiles

    # v7x megacore: keep >= 2 grid steps to shard across the two TensorCores.
    if B * (T // t_tile) * (C // c_tile) < 2:
        for tt in (1024, 512, 256, 128):
            if tt < t_tile and T % tt == 0:
                t_tile = tt
                break

    per_step = 4 * c_tile * t_tile * dsize          # in+out, double-buffered
    vmem_limit = int(min(max(per_step + (2 << 20), 16 << 20), budget))
    bytes_accessed = 2 * B * C * T * dsize          # one read + one write

    if c_tile == C:
        grid = (B, T // t_tile)
        in_spec = pl.BlockSpec((pl.Squeezed(), C, t_tile),
                               lambda b, t: (b, 0, t))
        out_spec = pl.BlockSpec((pl.Squeezed(), t_tile, C),
                                lambda b, t: (b, t, 0))
    else:
        grid = (B, T // t_tile, C // c_tile)
        in_spec = pl.BlockSpec((pl.Squeezed(), c_tile, t_tile),
                               lambda b, t, c: (b, c, t))
        out_spec = pl.BlockSpec((pl.Squeezed(), t_tile, c_tile),
                                lambda b, t, c: (b, t, c))

    return pl.pallas_call(
        _transpose_kernel,
        out_shape=jax.ShapeDtypeStruct((B, T, C), x.dtype),
        grid_spec=pltpu.PrefetchScalarGridSpec(
            num_scalar_prefetch=0,
            grid=grid,
            in_specs=[in_spec],
            out_specs=out_spec,
        ),
        compiler_params=pltpu.CompilerParams(
            dimension_semantics=("parallel",) * len(grid),
            vmem_limit_bytes=vmem_limit,
        ),
        cost_estimate=pl.CostEstimate(
            flops=0, transcendentals=0, bytes_accessed=bytes_accessed),
    )(x)


def permute_pallas(x, order=None):
    """Pallas equivalent of Permute(order) for the CRNN's channel-last moves.

    Kernel path (lane-dense batched transpose):
      * 3D x, order (0, 2, 1):     (B, C, T)    -> (B, T, C)
      * 4D x, order (0, 2, 3, 1):  (B, C, H, W) -> (B, H, W, C)
    Other orders (e.g. the trailing (1, 0, 2) batch/time swap) are pure layout
    metadata and go through XLA's transpose.
    """
    if order is None:
        order = (0, 2, 1) if x.ndim == 3 else (0, 2, 3, 1)
    order = tuple(int(o) for o in order)

    if x.ndim == 3 and order == (0, 2, 1):
        return _batched_transpose_021(x)
    if x.ndim == 4 and order == (0, 2, 3, 1):
        B, C, H, W = x.shape
        y = _batched_transpose_021(x.reshape(B, C, H * W))  # free reshapes
        return y.reshape(B, H, W, C)
    # TODO(synk): fuse these permutes into the consumer kernel's index_map
    # instead of materializing the permuted tensor in HBM.
    return jnp.transpose(x, order)


if __name__ == "__main__":
    key = jax.random.PRNGKey(0)
    k1, k2, k3, k4, k5 = jax.random.split(key, 5)

    # (1) NCHW feature map, order (0, 2, 3, 1): tiny C -> routed to XLA path.
    x4 = jax.random.normal(k1, (2, 4, 16, 16), dtype=jnp.float32)
    y4 = jax.block_until_ready(permute_pallas(x4, (0, 2, 3, 1)))
    assert jnp.array_equal(y4, jnp.transpose(x4, (0, 2, 3, 1))), "4D permute mismatch"

    # (2) Tiny rnn-head permute Permute((0, 2, 1)): lane-starved -> XLA path.
    x3 = jax.random.normal(k2, (2, 32, 8), dtype=jnp.float32)
    y3 = jax.block_until_ready(permute_pallas(x3, (0, 2, 1)))
    assert jnp.array_equal(y3, jnp.transpose(x3, (0, 2, 1))), "3D permute mismatch"

    # (3) Realistic CRNN rnn-head shape (C=512 conv channels): Pallas kernel,
    #     full-C tile -> contiguous output writeback, grid collapses to (B, T/t).
    xc = jax.random.normal(k3, (2, 512, 128), dtype=jnp.float32)
    yc = jax.block_until_ready(permute_pallas(xc, (0, 2, 1)))
    assert jnp.array_equal(yc, jnp.transpose(xc, (0, 2, 1))), "CRNN permute mismatch"

    # (4) Multi-step grid + packed-sublane dtype: Pallas kernel, grid (2, 3).
    xb = jax.random.normal(k4, (2, 256, 384), dtype=jnp.float32).astype(jnp.bfloat16)
    yb = jax.block_until_ready(permute_pallas(xb, (0, 2, 1)))
    assert jnp.array_equal(yb, jnp.transpose(xb, (0, 2, 1))), "bf16 tiled permute mismatch"

    # (5) Non-128-divisible T: guarded full-extent block through the kernel.
    xo = jax.random.normal(k5, (1, 136, 200), dtype=jnp.float32)
    yo = jax.block_until_ready(permute_pallas(xo, (0, 2, 1)))
    assert jnp.array_equal(yo, jnp.transpose(xo, (0, 2, 1))), "odd-shape permute mismatch"

    print("KERNEL_OK")
</pallas_src>

<mosaic_0001>
module attributes {stable_mosaic.version = 11 : i64} {
  func.func @_transpose_kernel(%arg0: i32, %arg1: i32, %arg2: memref<1x512x128xf32, #tpu.memory_space<vmem>>, %arg3: memref<1x128x512xf32, #tpu.memory_space<vmem>>) attributes {dimension_semantics = [#tpu.dimension_semantics<parallel>, #tpu.dimension_semantics<parallel>], iteration_bounds = array<i64: 2, 1>, scalar_prefetch = 0 : i64, scratch_operands = 0 : i64, tpu.core_type = #tpu.core_type<tc>, window_params = [{transform_indices = @transform_0, window_bounds = array<i64: 1, 512, 128>}, {transform_indices = @transform_1, window_bounds = array<i64: 1, 128, 512>}]} {
    %c0 = arith.constant 0 : index
    %c0_0 = arith.constant 0 : index
    %c0_1 = arith.constant 0 : index
    %0 = vector.load %arg2[%c0, %c0_0, %c0_1] : memref<1x512x128xf32, #tpu.memory_space<vmem>>, vector<1x512x128xf32>
    %1 = vector.shape_cast %0 : vector<1x512x128xf32> to vector<512x128xf32>
    %2 = tpu.transpose %1, [1, 0] : vector<512x128xf32> -> vector<128x512xf32>
    %c0_2 = arith.constant 0 : index
    %c0_3 = arith.constant 0 : index
    %c0_4 = arith.constant 0 : index
    %3 = vector.load %arg3[%c0_2, %c0_3, %c0_4] : memref<1x128x512xf32, #tpu.memory_space<vmem>>, vector<1x128x512xf32>
    %4 = vector.shape_cast %3 : vector<1x128x512xf32> to vector<128x512xf32>
    %5 = vector.shape_cast %2 : vector<128x512xf32> to vector<1x128x512xf32>
    tpu.vector_store %arg3[%c0_2, %c0_3, %c0_4], %5 {strides = array<i32>} : memref<1x128x512xf32, #tpu.memory_space<vmem>>, vector<1x128x512xf32>,
    return
  }
  func.func @transform_0(%arg0: i32, %arg1: i32) -> (i32, i32, i32) {
    %c0_i32 = arith.constant 0 : i32
    %c0_i32_0 = arith.constant 0 : i32
    return %arg0, %c0_i32, %arg1 : i32, i32, i32
  }
  func.func @transform_1(%arg0: i32, %arg1: i32) -> (i32, i32, i32) {
    %c0_i32 = arith.constant 0 : i32
    %c0_i32_0 = arith.constant 0 : i32
    return %arg0, %arg1, %c0_i32 : i32, i32, i32
  }
}

</mosaic_0001>

<bundles_post_ra>
// kernel: tpu_custom_call.1
= control target key start
LH: loop header
LB: loop body
LE: loop exit
PB: predicated region body
PF: predicated region fallthrough
CT: control target
= control target key end

     0   :  { %6 = vsyncpa [#allocation3], 0  ;;  %s1004_s0 = inlined_call_operand.hbm [shape: f32[2,512,128], index: 0, kind: input, shape index: {}]   ;;  %s1005_s1 = inlined_call_operand.hbm [shape: f32[2,128,512], index: 1, kind: output, shape index: {}]  }
   0x1   :  { %8 = vsyncpa [#allocation3 + $0x1], 0 }
   0x2   :  { %9 = vsyncpa [#allocation4], 0 }
   0x3   :  { %11 = vsyncpa [#allocation4 + $0x1], 0  ;;  %s721_s6 = smov 0   ;;  %s723_s7 = smov 0  }
   0x4   :  { %s725_s8 = smov 0   ;;  %s727_s9 = smov 0  }
   0x5   :  { %s729_s10 = smov 0   ;;  %s731_s11 = smov 0  }
   0x6 LB: > { %s512_s12 = sadd.s32 4294967295, %s703_s11   ;;  %s513_s13 = sadd.s32 4294967294, %s703_s11   ;;  %s703_s11 = sphi %s731_s11, %s17_s11   ;;  %s699_s10 = sphi %s729_s10, %s1016_s10   ;;  %s695_s9 = sphi %s727_s9, %s1015_s9   ;;  %s691_s8 = sphi %s725_s8, %s1014_s8   ;;  %s687_s7 = sphi %s723_s7, %s1013_s7   ;;  %s683_s6 = sphi %s721_s6, %s1012_s6  }
   0x7   : > { %s29_s14 = sadd.s32 1, %s699_s10  ;;  %s38_s15 = sadd.s32 1, %s691_s8 }
   0x8   : > { %p31_p0 = scmp.ge.s32.totalorder %s29_s14, 2  ;;  %p45_p1 = scmp.ne.s32.totalorder %s691_s8, %s687_s7 }
   0x9   : > { %p46_p2 = scmp.eq.s32.totalorder %s703_s11, 0  ;;  %p51_p3 = scmp.ne.s32.totalorder %s687_s7, %s683_s6 }
   0xa   : > { %s1018_s14 = smov (%p31_p0, %s29_s14), 0  ;;  %p52_p5 = scmp.eq.s32.totalorder %s512_s12, 0 }
   0xb   : > { %p762_p4 = por %p46_p2, %p45_p1  ;;  %s33_s17 = ssub.s32 %s699_s10, %s1018_s14 }
   0xc   : > { %p77_p6 = scmp.eq.s32.totalorder %s512_s12, 1  ;;  %p36_p7 = scmp.eq.s32.totalorder %s33_s17, 0 }
   0xd   : > { %p768_p8 = por %p52_p5, %p51_p3  ;;  %p83_p10 = scmp.eq.s32.totalorder %s513_s13, 1 }
   0xe   : > { %p772_p9 = por %p77_p6, %p45_p1  ;;  %p541_p13 = scmp.lt.s32.totalorder %s703_s11, 2 }
   0xf   : > { %s777_s20 = scalar_select %p36_p7, %s691_s8, %s38_s15  }
  0x10   : > { %p779_p11 = por %p83_p10, %p51_p3  ;;  %s103_s22 = sand.u32 1, %s691_s8  }
  0x11   : > { %s516_s23 = sshll.u32 %s103_s22, 9  ;;  %s527_s24 = sshll.u32 %s699_s10, 13 }
  0x12   : > { %s114_s27 = scalar_lea.hbm %s1004_s0, %s527_s24  ;;  %s107_s28 = scalar_lea.vmem [#allocation2], %s516_s23 }
  0x13   : > { %s115_s29 = sshll.u32 %s107_s28, 4  ;;  %p792_p0 = pnand %p541_p13, %p762_p4  ;;  %s116_s29 = int_to_ptr.vmem [resolvable:$true] %s115_s29 }
  0x14   : > { %p519_p1 = scmp.ge.s32.totalorder %s703_s11, 1  ;;  %s104_s2 = scalar_lea.sflag [#allocation3], %s103_s22 }
  0x15   : > { %p597_p2 = pneg %p792_p0  ;;  %s608_s3 = scalar_lea.vmem %s116_s29, 8192 }
  0x16   : > { %p609_p3 = scmp.ne.s32.totalorder %s116_s29, %s608_s3  ;;  %s705_s4 = smov [#allocation2]  }
  0x17   : > { %s613_s5 = sshll.u32 %s705_s4, 4  ;;  %s614_s5 = int_to_ptr.vmem [resolvable:$false] %s613_s5 }
  0x18   : > { %p611_p5 = pnand %p609_p3, %p597_p2  ;;  %s615_s12 = scalar_lea.vmem %s614_s5, 16384 }
  0x19   : > { %p616_p7 = scmp.lt.s32.totalorder %s116_s29, %s614_s5  ;;  %p617_p10 = scmp.lt.s32.totalorder %s615_s12, %s608_s3 }
  0x1a   : > { %p612_p6 = pneg %p611_p5 }
  0x1b   : > { %p618_p12 = por %p617_p10, %p616_p7 }
  0x1d   : > { %p619_p4 = pnand %p618_p12, %p612_p6 }
  0x1f   : > { %622 = shalt.err (!%p619_p4)
}
  0x20   : > { %s706_s13 = smov 128   ;;  %s707_s15 = smov 8  }
  0x21   : > { %536 = dma.hbm_to_vmem [thread:$0]  (!%p792_p0), %s114_s27, 8192, %s116_s29, %s104_s2, %s706_s13, %s706_s13, %s707_s15  }
  0x22   : > { %p123_p13 = scmp.lt.s32.totalorder %s703_s11, 3 }
  0x24   : > { %p124_p2 = pnand %p519_p1, %p123_p13 }
  0x25   : > { %s805_s16 = sand.u32 (!%p124_p2), 1, %s687_s7  }
  0x26   : > { %127 = sbr.rel (%p124_p2) target bundleno = 309 (0x135), region = 24  ;;  %s520_s17 = sshll.u32 (!%p124_p2), %s805_s16, 9 }
  0x27   : > { %s130_s22 = scalar_lea.sflag (!%p124_p2), [#allocation3], %s805_s16  ;;  %s811_s23 = scalar_lea.vmem (!%p124_p2), [#allocation2], %s520_s17 }
  0x2b   : > { %674 = dma.done.wait (%p768_p8), %s130_s22, 8192  }
  0x2c   : > { %676 = vsyncadd (%p768_p8), %s130_s22, 4294959104  ;;  %v169_v0 = vld [vmem:[%s811_s23 + $0x80] sm:$0xff]  ;;  %v170_v2 = vld [vmem:[%s811_s23 + $0x88] sm:$0xff]  ;;  %s883_s18 = scalar_lea.vmem [#allocation5], %s520_s17  ;;  %s528_s24 = sshll.u32 %s695_s9, 13 }
  0x2d   : > { %v153_v1 = vld [vmem:[%s811_s23] sm:$0xff]  ;;  %249 = vxpose.xlu1.b32.start [1/16] %v169_v0, 128  ;;  %v154_v3 = vld [vmem:[%s811_s23 + $0x8] sm:$0xff]  ;;  %v171_v4 = vld [vmem:[%s811_s23 + $0x90] sm:$0xff]  ;;  %s426_s25 = sshll.u32 %s883_s18, 4  ;;  %s952_s28 = scalar_lea.hbm %s1005_s1, %s528_s24  ;;  %s954_s25 = int_to_ptr.vmem [resolvable:$true] %s426_s25 }
  0x2e   : > { %217 = vxpose.xlu0.b32.start [1/16] %v153_v1, 128  ;;  %v155_v5 = vld [vmem:[%s811_s23 + $0x10] sm:$0xff]  ;;  %v172_v6 = vld [vmem:[%s811_s23 + $0x98] sm:$0xff]  ;;  %v173_v8 = vld [vmem:[%s811_s23 + $0xa0] sm:$0xff]  ;;  %s410_s9 = scalar_lea.sflag [#allocation4], %s805_s16  ;;  %s623_s29 = scalar_lea.vmem %s954_s25, 8192 }
  0x2f   : > { %v156_v7 = vld [vmem:[%s811_s23 + $0x18] sm:$0xff]  ;;  %v157_v9 = vld [vmem:[%s811_s23 + $0x20] sm:$0xff]  ;;  %v174_v10 = vld [vmem:[%s811_s23 + $0xa8] sm:$0xff]  ;;  %p624_p8 = scmp.ne.s32.totalorder %s954_s25, %s623_s29  ;;  %s708_s30 = smov [#allocation5]  }
  0x30   : > { %v158_v11 = vld [vmem:[%s811_s23 + $0x28] sm:$0xff]  ;;  %v175_v12 = vld [vmem:[%s811_s23 + $0xb0] sm:$0xff]  ;;  %v176_v14 = vld [vmem:[%s811_s23 + $0xb8] sm:$0xff]  ;;  %s627_s2 = sshll.u32 %s708_s30, 4  ;;  %s628_s2 = int_to_ptr.vmem [resolvable:$false] %s627_s2 }
  0x31   : > { %250 = vxpose.xlu1.b32.cont [2/16] %v170_v2, 128  ;;  %v159_v13 = vld [vmem:[%s811_s23 + $0x30] sm:$0xff]  ;;  %v160_v15 = vld [vmem:[%s811_s23 + $0x38] sm:$0xff]  ;;  %v177_v16 = vld [vmem:[%s811_s23 + $0xc0] sm:$0xff]  ;;  %p625_p12 = pnand %p624_p8, %p772_p9  ;;  %s629_s3 = scalar_lea.vmem %s628_s2, 16384 }
  0x32   : > { %218 = vxpose.xlu0.b32.cont [2/16] %v154_v3, 128  ;;  %v161_v17 = vld [vmem:[%s811_s23 + $0x40] sm:$0xff]  ;;  %v178_v18 = vld [vmem:[%s811_s23 + $0xc8] sm:$0xff]  ;;  %v179_v20 = vld [vmem:[%s811_s23 + $0xd0] sm:$0xff]  ;;  %p630_p1 = scmp.lt.s32.totalorder %s954_s25, %s628_s2  ;;  %p631_p3 = scmp.lt.s32.totalorder %s629_s3, %s623_s29 }
  0x33   : > { %v162_v19 = vld [vmem:[%s811_s23 + $0x48] sm:$0xff]  ;;  %v163_v21 = vld [vmem:[%s811_s23 + $0x50] sm:$0xff]  ;;  %v180_v22 = vld [vmem:[%s811_s23 + $0xd8] sm:$0xff]  ;;  %p626_p0 = pneg %p625_p12 }
  0x34   : > { %v164_v23 = vld [vmem:[%s811_s23 + $0x58] sm:$0xff]  ;;  %v181_v24 = vld [vmem:[%s811_s23 + $0xe0] sm:$0xff]  ;;  %v182_v26 = vld [vmem:[%s811_s23 + $0xe8] sm:$0xff]  ;;  %p632_p5 = por %p631_p3, %p630_p1 }
  0x35   : > { %251 = vxpose.xlu1.b32.cont [3/16] %v171_v4, 128  ;;  %v165_v25 = vld [vmem:[%s811_s23 + $0x60] sm:$0xff]  ;;  %v166_v27 = vld [vmem:[%s811_s23 + $0x68] sm:$0xff]  ;;  %v183_v28 = vld [vmem:[%s811_s23 + $0xf0] sm:$0xff] }
  0x36   : > { %219 = vxpose.xlu0.b32.cont [3/16] %v155_v5, 128  ;;  %v167_v29 = vld [vmem:[%s811_s23 + $0x70] sm:$0xff]  ;;  %v184_v30 = vld [vmem:[%s811_s23 + $0xf8] sm:$0xff]  ;;  %v201_v32 = vld [vmem:[%s811_s23 + $0x180] sm:$0xff]  ;;  %p633_p6 = pnand %p632_p5, %p626_p0 }
  0x37   : > { %v168_v31 = vld [vmem:[%s811_s23 + $0x78] sm:$0xff]  ;;  %v185_v33 = vld [vmem:[%s811_s23 + $0x100] sm:$0xff]  ;;  %v202_v34 = vld [vmem:[%s811_s23 + $0x188] sm:$0xff] }
  0x38   : > { %v186_v35 = vld [vmem:[%s811_s23 + $0x108] sm:$0xff]  ;;  %v203_v36 = vld [vmem:[%s811_s23 + $0x190] sm:$0xff]  ;;  %v204_v38 = vld [vmem:[%s811_s23 + $0x198] sm:$0xff] }
  0x39   : > { %252 = vxpose.xlu1.b32.cont [4/16] %v172_v6, 128  ;;  %v187_v37 = vld [vmem:[%s811_s23 + $0x110] sm:$0xff]  ;;  %v188_v39 = vld [vmem:[%s811_s23 + $0x118] sm:$0xff]  ;;  %v205_v40 = vld [vmem:[%s811_s23 + $0x1a0] sm:$0xff] }
  0x3a   : > { %220 = vxpose.xlu0.b32.cont [4/16] %v156_v7, 128  ;;  %v189_v41 = vld [vmem:[%s811_s23 + $0x120] sm:$0xff]  ;;  %v206_v42 = vld [vmem:[%s811_s23 + $0x1a8] sm:$0xff]  ;;  %v207_v44 = vld [vmem:[%s811_s23 + $0x1b0] sm:$0xff] }
  0x3b   : > { %v190_v43 = vld [vmem:[%s811_s23 + $0x128] sm:$0xff]  ;;  %v191_v45 = vld [vmem:[%s811_s23 + $0x130] sm:$0xff]  ;;  %v208_v46 = vld [vmem:[%s811_s23 + $0x1b8] sm:$0xff] }
  0x3c   : > { %v192_v47 = vld [vmem:[%s811_s23 + $0x138] sm:$0xff]  ;;  %v209_v48 = vld [vmem:[%s811_s23 + $0x1c0] sm:$0xff]  ;;  %v210_v50 = vld [vmem:[%s811_s23 + $0x1c8] sm:$0xff] }
  0x3d   : > { %253 = vxpose.xlu1.b32.cont [5/16] %v173_v8, 128  ;;  %v193_v49 = vld [vmem:[%s811_s23 + $0x140] sm:$0xff]  ;;  %v194_v51 = vld [vmem:[%s811_s23 + $0x148] sm:$0xff]  ;;  %v211_v52 = vld [vmem:[%s811_s23 + $0x1d0] sm:$0xff] }
  0x3e   : > { %221 = vxpose.xlu0.b32.cont [5/16] %v157_v9, 128  ;;  %v195_v53 = vld [vmem:[%s811_s23 + $0x150] sm:$0xff]  ;;  %v212_v54 = vld [vmem:[%s811_s23 + $0x1d8] sm:$0xff]  ;;  %v213_v56 = vld [vmem:[%s811_s23 + $0x1e0] sm:$0xff] }
  0x3f   : > { %v196_v55 = vld [vmem:[%s811_s23 + $0x158] sm:$0xff]  ;;  %v197_v57 = vld [vmem:[%s811_s23 + $0x160] sm:$0xff]  ;;  %v214_v58 = vld [vmem:[%s811_s23 + $0x1e8] sm:$0xff] }
  0x40   : > { %v198_v59 = vld [vmem:[%s811_s23 + $0x168] sm:$0xff]  ;;  %v215_v60 = vld [vmem:[%s811_s23 + $0x1f0] sm:$0xff]  ;;  %v216_v62 = vld [vmem:[%s811_s23 + $0x1f8] sm:$0xff] }
  0x41   : > { %254 = vxpose.xlu1.b32.cont [6/16] %v174_v10, 128  ;;  %v199_v61 = vld [vmem:[%s811_s23 + $0x170] sm:$0xff]  ;;  %v200_v63 = vld [vmem:[%s811_s23 + $0x178] sm:$0xff] }
  0x42   : > { %222 = vxpose.xlu0.b32.cont [6/16] %v158_v11, 128 }
  0x45   : > { %255 = vxpose.xlu1.b32.cont [7/16] %v175_v12, 128 }
  0x46   : > { %223 = vxpose.xlu0.b32.cont [7/16] %v159_v13, 128 }
  0x49   : > { %256 = vxpose.xlu1.b32.cont [8/16] %v176_v14, 128 }
  0x4a   : > { %224 = vxpose.xlu0.b32.cont [8/16] %v160_v15, 128 }
  0x4d   : > { %257 = vxpose.xlu1.b32.cont [9/16] %v177_v16, 128 }
  0x4e   : > { %225 = vxpose.xlu0.b32.cont [9/16] %v161_v17, 128 }
  0x51   : > { %258 = vxpose.xlu1.b32.cont [10/16] %v178_v18, 128 }
  0x52   : > { %226 = vxpose.xlu0.b32.cont [10/16] %v162_v19, 128 }
  0x55   : > { %259 = vxpose.xlu1.b32.cont [11/16] %v179_v20, 128 }
  0x56   : > { %227 = vxpose.xlu0.b32.cont [11/16] %v163_v21, 128 }
  0x59   : > { %260 = vxpose.xlu1.b32.cont [12/16] %v180_v22, 128 }
  0x5a   : > { %228 = vxpose.xlu0.b32.cont [12/16] %v164_v23, 128 }
  0x5d   : > { %261 = vxpose.xlu1.b32.cont [13/16] %v181_v24, 128 }
  0x5e   : > { %229 = vxpose.xlu0.b32.cont [13/16] %v165_v25, 128 }
  0x61   : > { %262 = vxpose.xlu1.b32.cont [14/16] %v182_v26, 128 }
  0x62   : > { %230 = vxpose.xlu0.b32.cont [14/16] %v166_v27, 128 }
  0x65   : > { %263 = vxpose.xlu1.b32.cont [15/16] %v183_v28, 128 }
  0x66   : > { %231 = vxpose.xlu0.b32.cont [15/16] %v167_v29, 128 }
  0x69   : > { %264 = vxpose.xlu1.b32.end [16/16] %v184_v30, 128 }
  0x6a   : > { %232 = vxpose.xlu0.b32.end [16/16] %v168_v31, 128 }
  0x6d   : > { %313 = vxpose.xlu1.b32.start [1/16] %v201_v32, 128 }
  0x6e   : > { %281 = vxpose.xlu0.b32.start [1/16] %v185_v33, 128 }
  0x71   : > { %314 = vxpose.xlu1.b32.cont [2/16] %v202_v34, 128 }
  0x72   : > { %282 = vxpose.xlu0.b32.cont [2/16] %v186_v35, 128 }
  0x75   : > { %315 = vxpose.xlu1.b32.cont [3/16] %v203_v36, 128 }
  0x76   : > { %283 = vxpose.xlu0.b32.cont [3/16] %v187_v37, 128 }
  0x79   : > { %316 = vxpose.xlu1.b32.cont [4/16] %v204_v38, 128 }
  0x7a   : > { %284 = vxpose.xlu0.b32.cont [4/16] %v188_v39, 128 }
  0x7d   : > { %317 = vxpose.xlu1.b32.cont [5/16] %v205_v40, 128 }
  0x7e   : > { %285 = vxpose.xlu0.b32.cont [5/16] %v189_v41, 128 }
  0x81   : > { %318 = vxpose.xlu1.b32.cont [6/16] %v206_v42, 128 }
  0x82   : > { %286 = vxpose.xlu0.b32.cont [6/16] %v190_v43, 128 }
  0x85   : > { %319 = vxpose.xlu1.b32.cont [7/16] %v207_v44, 128 }
  0x86   : > { %287 = vxpose.xlu0.b32.cont [7/16] %v191_v45, 128 }
  0x89   : > { %320 = vxpose.xlu1.b32.cont [8/16] %v208_v46, 128 }
  0x8a   : > { %288 = vxpose.xlu0.b32.cont [8/16] %v192_v47, 128 }
  0x8d   : > { %321 = vxpose.xlu1.b32.cont [9/16] %v209_v48, 128 }
  0x8e   : > { %289 = vxpose.xlu0.b32.cont [9/16] %v193_v49, 128 }
  0x91   : > { %322 = vxpose.xlu1.b32.cont [10/16] %v210_v50, 128 }
  0x92   : > { %290 = vxpose.xlu0.b32.cont [10/16] %v194_v51, 128 }
  0x95   : > { %323 = vxpose.xlu1.b32.cont [11/16] %v211_v52, 128 }
  0x96   : > { %291 = vxpose.xlu0.b32.cont [11/16] %v195_v53, 128 }
  0x99   : > { %324 = vxpose.xlu1.b32.cont [12/16] %v212_v54, 128 }
  0x9a   : > { %292 = vxpose.xlu0.b32.cont [12/16] %v196_v55, 128 }
  0x9d   : > { %325 = vxpose.xlu1.b32.cont [13/16] %v213_v56, 128 }
  0x9e   : > { %293 = vxpose.xlu0.b32.cont [13/16] %v197_v57, 128 }
  0xa1   : > { %326 = vxpose.xlu1.b32.cont [14/16] %v214_v58, 128 }
  0xa2   : > { %294 = vxpose.xlu0.b32.cont [14/16] %v198_v59, 128 }
  0xa5   : > { %327 = vxpose.xlu1.b32.cont [15/16] %v215_v60, 128 }
  0xa6   : > { %295 = vxpose.xlu0.b32.cont [15/16] %v199_v61, 128 }
  0xa9   : > { %328 = vxpose.xlu1.b32.end [16/16] %v216_v62, 128  ;;  %v265_v0 = vpop.trf.xlu1 }
  0xaa   : > { %296 = vxpose.xlu0.b32.end [16/16] %v200_v63, 128  ;;  %v233_v1 = vpop.trf.xlu0  ;;  %346 = vst [vmem:[%s883_s18 + $0x8] sm:$0xff] %v265_v0 }
  0xab   : > { %345 = vst [vmem:[%s883_s18] sm:$0xff] %v233_v1 }
  0xad   : > { %v266_v2 = vpop.trf.xlu1 }
  0xae   : > { %v234_v3 = vpop.trf.xlu0  ;;  %350 = vst [vmem:[%s883_s18 + $0x28] sm:$0xff] %v266_v2 }
  0xaf   : > { %349 = vst [vmem:[%s883_s18 + $0x20] sm:$0xff] %v234_v3 }
  0xb1   : > { %v267_v4 = vpop.trf.xlu1 }
  0xb2   : > { %v235_v5 = vpop.trf.xlu0  ;;  %354 = vst [vmem:[%s883_s18 + $0x48] sm:$0xff] %v267_v4 }
  0xb3   : > { %353 = vst [vmem:[%s883_s18 + $0x40] sm:$0xff] %v235_v5 }
  0xb5   : > { %v268_v6 = vpop.trf.xlu1 }
  0xb6   : > { %v236_v7 = vpop.trf.xlu0  ;;  %358 = vst [vmem:[%s883_s18 + $0x68] sm:$0xff] %v268_v6 }
  0xb7   : > { %357 = vst [vmem:[%s883_s18 + $0x60] sm:$0xff] %v236_v7 }
  0xb9   : > { %v269_v8 = vpop.trf.xlu1 }
  0xba   : > { %v237_v9 = vpop.trf.xlu0  ;;  %362 = vst [vmem:[%s883_s18 + $0x88] sm:$0xff] %v269_v8 }
  0xbb   : > { %361 = vst [vmem:[%s883_s18 + $0x80] sm:$0xff] %v237_v9 }
  0xbd   : > { %v270_v10 = vpop.trf.xlu1 }
  0xbe   : > { %v238_v11 = vpop.trf.xlu0  ;;  %366 = vst [vmem:[%s883_s18 + $0xa8] sm:$0xff] %v270_v10 }
  0xbf   : > { %365 = vst [vmem:[%s883_s18 + $0xa0] sm:$0xff] %v238_v11 }
  0xc1   : > { %v271_v12 = vpop.trf.xlu1 }
  0xc2   : > { %v239_v13 = vpop.trf.xlu0  ;;  %370 = vst [vmem:[%s883_s18 + $0xc8] sm:$0xff] %v271_v12 }
  0xc3   : > { %369 = vst [vmem:[%s883_s18 + $0xc0] sm:$0xff] %v239_v13 }
  0xc5   : > { %v272_v14 = vpop.trf.xlu1 }
  0xc6   : > { %v240_v15 = vpop.trf.xlu0  ;;  %374 = vst [vmem:[%s883_s18 + $0xe8] sm:$0xff] %v272_v14 }
  0xc7   : > { %373 = vst [vmem:[%s883_s18 + $0xe0] sm:$0xff] %v240_v15 }
  0xc9   : > { %v273_v16 = vpop.trf.xlu1 }
  0xca   : > { %v241_v17 = vpop.trf.xlu0  ;;  %378 = vst [vmem:[%s883_s18 + $0x108] sm:$0xff] %v273_v16 }
  0xcb   : > { %377 = vst [vmem:[%s883_s18 + $0x100] sm:$0xff] %v241_v17 }
  0xcd   : > { %v274_v18 = vpop.trf.xlu1 }
  0xce   : > { %v242_v19 = vpop.trf.xlu0  ;;  %382 = vst [vmem:[%s883_s18 + $0x128] sm:$0xff] %v274_v18 }
  0xcf   : > { %381 = vst [vmem:[%s883_s18 + $0x120] sm:$0xff] %v242_v19 }
  0xd1   : > { %v275_v20 = vpop.trf.xlu1 }
  0xd2   : > { %v243_v21 = vpop.trf.xlu0  ;;  %386 = vst [vmem:[%s883_s18 + $0x148] sm:$0xff] %v275_v20 }
  0xd3   : > { %385 = vst [vmem:[%s883_s18 + $0x140] sm:$0xff] %v243_v21 }
  0xd5   : > { %v276_v22 = vpop.trf.xlu1 }
  0xd6   : > { %v244_v23 = vpop.trf.xlu0  ;;  %390 = vst [vmem:[%s883_s18 + $0x168] sm:$0xff] %v276_v22 }
  0xd7   : > { %389 = vst [vmem:[%s883_s18 + $0x160] sm:$0xff] %v244_v23 }
  0xd9   : > { %v277_v24 = vpop.trf.xlu1 }
  0xda   : > { %v245_v25 = vpop.trf.xlu0  ;;  %394 = vst [vmem:[%s883_s18 + $0x188] sm:$0xff] %v277_v24 }
  0xdb   : > { %393 = vst [vmem:[%s883_s18 + $0x180] sm:$0xff] %v245_v25 }
  0xdd   : > { %v278_v26 = vpop.trf.xlu1 }
  0xde   : > { %v246_v27 = vpop.trf.xlu0  ;;  %398 = vst [vmem:[%s883_s18 + $0x1a8] sm:$0xff] %v278_v26 }
  0xdf   : > { %397 = vst [vmem:[%s883_s18 + $0x1a0] sm:$0xff] %v246_v27 }
  0xe1   : > { %v279_v28 = vpop.trf.xlu1 }
  0xe2   : > { %v247_v29 = vpop.trf.xlu0  ;;  %402 = vst [vmem:[%s883_s18 + $0x1c8] sm:$0xff] %v279_v28 }
  0xe3   : > { %401 = vst [vmem:[%s883_s18 + $0x1c0] sm:$0xff] %v247_v29 }
  0xe5   : > { %v280_v30 = vpop.trf.xlu1 }
  0xe6   : > { %v248_v31 = vpop.trf.xlu0  ;;  %406 = vst [vmem:[%s883_s18 + $0x1e8] sm:$0xff] %v280_v30 }
  0xe7   : > { %405 = vst [vmem:[%s883_s18 + $0x1e0] sm:$0xff] %v248_v31 }
  0xe9   : > { %v329_v32 = vpop.trf.xlu1 }
  0xea   : > { %v297_v33 = vpop.trf.xlu0  ;;  %348 = vst [vmem:[%s883_s18 + $0x18] sm:$0xff] %v329_v32 }
  0xeb   : > { %347 = vst [vmem:[%s883_s18 + $0x10] sm:$0xff] %v297_v33 }
  0xed   : > { %v330_v34 = vpop.trf.xlu1 }
  0xee   : > { %v298_v35 = vpop.trf.xlu0  ;;  %352 = vst [vmem:[%s883_s18 + $0x38] sm:$0xff] %v330_v34 }
  0xef   : > { %351 = vst [vmem:[%s883_s18 + $0x30] sm:$0xff] %v298_v35 }
  0xf1   : > { %v331_v36 = vpop.trf.xlu1 }
  0xf2   : > { %v299_v37 = vpop.trf.xlu0  ;;  %356 = vst [vmem:[%s883_s18 + $0x58] sm:$0xff] %v331_v36 }
  0xf3   : > { %355 = vst [vmem:[%s883_s18 + $0x50] sm:$0xff] %v299_v37 }
  0xf5   : > { %v332_v38 = vpop.trf.xlu1 }
  0xf6   : > { %v300_v39 = vpop.trf.xlu0  ;;  %360 = vst [vmem:[%s883_s18 + $0x78] sm:$0xff] %v332_v38 }
  0xf7   : > { %359 = vst [vmem:[%s883_s18 + $0x70] sm:$0xff] %v300_v39 }
  0xf9   : > { %v333_v40 = vpop.trf.xlu1 }
  0xfa   : > { %v301_v41 = vpop.trf.xlu0  ;;  %364 = vst [vmem:[%s883_s18 + $0x98] sm:$0xff] %v333_v40 }
  0xfb   : > { %363 = vst [vmem:[%s883_s18 + $0x90] sm:$0xff] %v301_v41 }
  0xfd   : > { %v334_v42 = vpop.trf.xlu1 }
  0xfe   : > { %v302_v43 = vpop.trf.xlu0  ;;  %368 = vst [vmem:[%s883_s18 + $0xb8] sm:$0xff] %v334_v42 }
  0xff   : > { %367 = vst [vmem:[%s883_s18 + $0xb0] sm:$0xff] %v302_v43 }
 0x101   : > { %v335_v44 = vpop.trf.xlu1 }
 0x102   : > { %v303_v45 = vpop.trf.xlu0  ;;  %372 = vst [vmem:[%s883_s18 + $0xd8] sm:$0xff] %v335_v44 }
 0x103   : > { %371 = vst [vmem:[%s883_s18 + $0xd0] sm:$0xff] %v303_v45 }
 0x105   : > { %v336_v46 = vpop.trf.xlu1 }
 0x106   : > { %v304_v47 = vpop.trf.xlu0  ;;  %376 = vst [vmem:[%s883_s18 + $0xf8] sm:$0xff] %v336_v46 }
 0x107   : > { %375 = vst [vmem:[%s883_s18 + $0xf0] sm:$0xff] %v304_v47 }
 0x109   : > { %v337_v48 = vpop.trf.xlu1 }
 0x10a   : > { %v305_v49 = vpop.trf.xlu0  ;;  %380 = vst [vmem:[%s883_s18 + $0x118] sm:$0xff] %v337_v48 }
 0x10b   : > { %379 = vst [vmem:[%s883_s18 + $0x110] sm:$0xff] %v305_v49 }
 0x10d   : > { %v338_v50 = vpop.trf.xlu1 }
 0x10e   : > { %v306_v51 = vpop.trf.xlu0  ;;  %384 = vst [vmem:[%s883_s18 + $0x138] sm:$0xff] %v338_v50 }
 0x10f   : > { %383 = vst [vmem:[%s883_s18 + $0x130] sm:$0xff] %v306_v51 }
 0x111   : > { %v339_v52 = vpop.trf.xlu1 }
 0x112   : > { %v307_v53 = vpop.trf.xlu0  ;;  %388 = vst [vmem:[%s883_s18 + $0x158] sm:$0xff] %v339_v52 }
 0x113   : > { %387 = vst [vmem:[%s883_s18 + $0x150] sm:$0xff] %v307_v53 }
 0x115   : > { %v340_v54 = vpop.trf.xlu1 }
 0x116   : > { %v308_v55 = vpop.trf.xlu0  ;;  %392 = vst [vmem:[%s883_s18 + $0x178] sm:$0xff] %v340_v54 }
 0x117   : > { %391 = vst [vmem:[%s883_s18 + $0x170] sm:$0xff] %v308_v55 }
 0x119   : > { %v341_v56 = vpop.trf.xlu1 }
 0x11a   : > { %v309_v57 = vpop.trf.xlu0  ;;  %396 = vst [vmem:[%s883_s18 + $0x198] sm:$0xff] %v341_v56 }
 0x11b   : > { %395 = vst [vmem:[%s883_s18 + $0x190] sm:$0xff] %v309_v57 }
 0x11d   : > { %v342_v58 = vpop.trf.xlu1 }
 0x11e   : > { %v310_v59 = vpop.trf.xlu0  ;;  %400 = vst [vmem:[%s883_s18 + $0x1b8] sm:$0xff] %v342_v58 }
 0x11f   : > { %399 = vst [vmem:[%s883_s18 + $0x1b0] sm:$0xff] %v310_v59 }
 0x121   : > { %v343_v60 = vpop.trf.xlu1 }
 0x122   : > { %v311_v61 = vpop.trf.xlu0  ;;  %404 = vst [vmem:[%s883_s18 + $0x1d8] sm:$0xff] %v343_v60 }
 0x123   : > { %403 = vst [vmem:[%s883_s18 + $0x1d0] sm:$0xff] %v311_v61 }
 0x125   : > { %v344_v62 = vpop.trf.xlu1 }
 0x126   : > { %v312_v63 = vpop.trf.xlu0  ;;  %408 = vst [vmem:[%s883_s18 + $0x1f8] sm:$0xff] %v344_v62 }
 0x127   : > { %407 = vst [vmem:[%s883_s18 + $0x1f0] sm:$0xff] %v312_v63 }
 0x128   : > { %636 = shalt.err (!%p633_p6)
}
 0x129   : > { %s637_s4 = scalar_lea.hbm %s952_s28, 8192  ;;  %s641_s13 = scalar_lea.hbm %s1005_s1, 16384 }
 0x12a   : > { %p638_p7 = scmp.ne.s32.totalorder %s952_s28, %s637_s4  ;;  %p642_p13 = scmp.lt.s32.totalorder %s952_s28, %s1005_s1 }
 0x12b   : > { %p643_p2 = scmp.lt.s32.totalorder %s641_s13, %s637_s4 }
 0x12c   : > { %p639_p10 = pnand %p638_p7, %p772_p9 }
 0x12d   : > { %p644_p8 = por %p643_p2, %p642_p13 }
 0x12e   : > { %p640_p4 = pneg %p639_p10 }
 0x130   : > { %p645_p12 = pnand %p644_p8, %p640_p4 }
 0x132   : > { %648 = shalt.err (!%p645_p12)
}
 0x133   : > { %s709_s22 = smov 512   ;;  %s710_s23 = smov 32  }
 0x134   : > { %531 = dma.vmem_to_hbm [thread:$0]  (%p772_p9), %s954_s25, 8192, %s952_s28, %s410_s9, %s709_s22, %s709_s22, %s710_s23  }
 0x135 PF: > { %s441_s18 = sand.u32 1, %s683_s6   ;;  %p1011_p0 = scmp.ge.s32.totalorder %s703_s11, 2 }
 0x136   : > { %s442_s24 = scalar_lea.sflag [#allocation4], %s441_s18 }
 0x137   : > { %p538_p1 = pnand %p1011_p0, %p779_p11 }
 0x139   : > { %p539_p3 = pneg %p538_p1 }
 0x13b   : > { %678 = dma.done.wait (%p539_p3), %s442_s24, 8192  }
 0x13c   : > { %680 = vsyncadd (%p539_p3), %s442_s24, 4294959104  ;;  %s17_s11 = sadd.s32 1, %s703_s11   ;;  %s1012_s6 = smov %s687_s7 }
 0x13d   : > { %p14_p5 = scmp.ge.s32.totalorder %s17_s11, 4   ;;  %s1013_s7 = smov %s691_s8 }
 0x13e   : > { %s1014_s8 = smov %s777_s20  ;;  %s1015_s9 = smov %s699_s10 }
 0x13f   : > { %s1016_s10 = smov %s1018_s14  ;;  %16 = sbr.rel (!%p14_p5) target bundleno = 6 (0x6), region = 69 }
 0x144   :  { %447 = vsyncpa [#allocation3], 1 }
 0x145   :  { %449 = vsyncpa [#allocation3 + $0x1], 1 }
 0x146   :  { %450 = vsyncpa [#allocation4], 1 }
 0x147   :  { %452 = vsyncpa [#allocation4 + $0x1], 1 }

</bundles_post_ra>
